<compile_context>
chip_gen: v6e
topology: v6e:2x2x1
jax: 0.10.0
libtpu: 0.0.40
codegen_flags: <defaults>
</compile_context>

<pallas_src>
import functools

import jax
import jax.numpy as jnp
from jax import lax
from jax.experimental import pallas as pl
from jax.experimental.pallas import tpu as pltpu


# ---------------------------------------------------------------------------
# Tiled matmul + bias kernel (used for the QKV projection and for `wo`)
# ---------------------------------------------------------------------------

def _matmul_bias_kernel(x_ref, w_ref, b_ref, o_ref):
    # x_ref: (TM, Cin) row tile, w_ref: (Cin, Cout), b_ref: (1, Cout)
    acc = jnp.dot(x_ref[...], w_ref[...], preferred_element_type=jnp.float32)
    o_ref[...] = (acc + b_ref[...]).astype(o_ref.dtype)


def _round_up(x, m):
    return ((x + m - 1) // m) * m


def linear_pallas(x2d, weight, bias, *, tile_rows=512):
    """y = x2d @ weight.T + bias.

    x2d: (rows, Cin), weight: (Cout, Cin) (torch Linear layout), bias: (Cout,).
    Rows are padded so any row count works with large, aligned tiles.
    """
    rows, cin = x2d.shape
    cout = weight.shape[0]

    tm = min(tile_rows, _round_up(rows, 8))
    tm = max(8, (tm // 8) * 8)
    # Keep >= 2 grid steps when possible so both v7x TensorCores get work.
    if rows >= 16 and pl.cdiv(rows, tm) < 2:
        tm = max(8, _round_up(rows, 16) // 2)

    rows_p = _round_up(rows, tm)
    if rows_p != rows:
        x2d = jnp.pad(x2d, ((0, rows_p - rows), (0, 0)))

    w_t = weight.T                       # (Cin, Cout) - lane-dense output
    b2d = bias.reshape(1, cout)

    out = pl.pallas_call(
        _matmul_bias_kernel,
        out_shape=jax.ShapeDtypeStruct((rows_p, cout), x2d.dtype),
        grid_spec=pltpu.PrefetchScalarGridSpec(
            num_scalar_prefetch=0,
            grid=(rows_p // tm,),
            in_specs=[
                pl.BlockSpec((tm, cin), lambda i: (i, 0)),
                pl.BlockSpec((cin, cout), lambda i: (0, 0)),
                pl.BlockSpec((1, cout), lambda i: (0, 0)),
            ],
            out_specs=pl.BlockSpec((tm, cout), lambda i: (i, 0)),
        ),
        compiler_params=pltpu.CompilerParams(
            dimension_semantics=("parallel",)),
    )(x2d, w_t, b2d)

    return out[:rows]


# ---------------------------------------------------------------------------
# Routed (gathered) attention kernel: scalar-prefetch gather + online softmax
# ---------------------------------------------------------------------------

def _routed_attn_kernel(ridx_ref, q_ref, k_ref, v_ref, o_ref,
                        m_sc, l_sc, acc_sc, *, scale):
    # ridx_ref only drives the index_maps (data-dependent KV gather).
    del ridx_ref
    t = pl.program_id(1)

    @pl.when(t == 0)
    def _():
        m_sc[...] = jnp.full(m_sc.shape, -jnp.inf, m_sc.dtype)
        l_sc[...] = jnp.zeros_like(l_sc)
        acc_sc[...] = jnp.zeros_like(acc_sc)

    q = q_ref[...]     # (heads, w2, d_qk)
    k = k_ref[...]     # (heads, w2, d_qk)  -- routed region t for this query region
    v = v_ref[...]     # (heads, w2, d_v)

    s = jnp.einsum('hqd,hkd->hqk', q, k,
                   preferred_element_type=jnp.float32) * scale   # (heads, w2, w2)

    m_prev = m_sc[...]
    m_new = jnp.maximum(m_prev, s.max(axis=-1, keepdims=True))
    alpha = jnp.exp(m_prev - m_new)
    p = jnp.exp(s - m_new)
    l_sc[...] = alpha * l_sc[...] + p.sum(axis=-1, keepdims=True)
    acc_sc[...] = alpha * acc_sc[...] + jnp.einsum(
        'hqk,hkd->hqd', p.astype(v.dtype), v,
        preferred_element_type=jnp.float32)
    m_sc[...] = m_new

    @pl.when(t == pl.num_programs(1) - 1)
    def _():
        o_ref[...] = (acc_sc[...] / l_sc[...]).astype(o_ref.dtype)


def routed_attention(q_pix, kv_pix, r_idx, *, num_heads, qk_dim, dim, scale):
    """Fused KV-gather + attention.

    q_pix:  (n, p2, w2, qk_dim)
    kv_pix: (n, p2, w2, qk_dim + dim)
    r_idx:  (n, p2, topk) int — routed region indices per query region.
    Returns (n*p2, num_heads, w2, dim // num_heads).
    """
    n, p2, w2, _ = q_pix.shape
    topk = r_idx.shape[-1]
    dqk = qk_dim // num_heads
    dv = dim // num_heads

    # Head-split layout plumbing (wrapper-side; lane-dense per-head slabs).
    q_heads = q_pix.reshape(n * p2, w2, num_heads, dqk).transpose(0, 2, 1, 3)
    k_heads = kv_pix[..., :qk_dim].reshape(n, p2, w2, num_heads, dqk)
    k_heads = k_heads.transpose(0, 1, 3, 2, 4)
    v_heads = kv_pix[..., qk_dim:].reshape(n, p2, w2, num_heads, dv)
    v_heads = v_heads.transpose(0, 1, 3, 2, 4)
    ridx_flat = r_idx.reshape(n * p2, topk).astype(jnp.int32)

    kernel = functools.partial(_routed_attn_kernel, scale=scale)

    out_heads = pl.pallas_call(
        kernel,
        out_shape=jax.ShapeDtypeStruct((n * p2, num_heads, w2, dv), q_pix.dtype),
        grid_spec=pltpu.PrefetchScalarGridSpec(
            num_scalar_prefetch=1,
            grid=(n * p2, topk),
            in_specs=[
                pl.BlockSpec((pl.Squeezed(), num_heads, w2, dqk),
                             lambda b, t, ridx: (b, 0, 0, 0)),
                pl.BlockSpec((pl.Squeezed(), pl.Squeezed(), num_heads, w2, dqk),
                             lambda b, t, ridx: (b // p2, ridx[b, t], 0, 0, 0)),
                pl.BlockSpec((pl.Squeezed(), pl.Squeezed(), num_heads, w2, dv),
                             lambda b, t, ridx: (b // p2, ridx[b, t], 0, 0, 0)),
            ],
            out_specs=pl.BlockSpec((pl.Squeezed(), num_heads, w2, dv),
                                   lambda b, t, ridx: (b, 0, 0, 0)),
            scratch_shapes=[
                pltpu.VMEM((num_heads, w2, 1), jnp.float32),   # running max
                pltpu.VMEM((num_heads, w2, 1), jnp.float32),   # running sum
                pltpu.VMEM((num_heads, w2, dv), jnp.float32),  # output accum
            ],
        ),
        compiler_params=pltpu.CompilerParams(
            dimension_semantics=("parallel", "arbitrary")),
    )(ridx_flat, q_heads, k_heads, v_heads)

    return out_heads


# ---------------------------------------------------------------------------
# Small JAX helpers (non-Pallas pieces of the module)
# ---------------------------------------------------------------------------

def depthwise_conv3x3_nhwc(x, w, b):
    """LePE: depthwise 3x3 conv. x: (N,H,W,C), w: (C,1,3,3) torch layout, b: (C,)."""
    c = x.shape[-1]
    k = jnp.transpose(w, (2, 3, 1, 0))          # (3, 3, 1, C) HWIO
    y = lax.conv_general_dilated(
        x, k, window_strides=(1, 1), padding=((1, 1), (1, 1)),
        dimension_numbers=('NHWC', 'HWIO', 'NHWC'),
        feature_group_count=c)
    return y + b


def _window_partition(x, n_win):
    # 'n (j h) (i w) c -> n (j i) h w c'
    n, hh, ww, c = x.shape
    h, w = hh // n_win, ww // n_win
    x = x.reshape(n, n_win, h, n_win, w, c).transpose(0, 1, 3, 2, 4, 5)
    return x.reshape(n, n_win * n_win, h, w, c)


def _window_merge(x, n_win, h, w):
    # 'n (j i) h w c -> n (j h) (i w) c'
    n = x.shape[0]
    c = x.shape[-1]
    x = x.reshape(n, n_win, n_win, h, w, c).transpose(0, 1, 3, 2, 4, 5)
    return x.reshape(n, n_win * h, n_win * w, c)


# ---------------------------------------------------------------------------
# Full BiLevelRoutingAttention forward (Pallas path)
# ---------------------------------------------------------------------------

def bi_level_routing_attention_forward(x, params, *, n_win, num_heads, topk,
                                        qk_dim=None):
    n, hh, ww, dim = x.shape
    qk_dim = qk_dim or dim
    scale = qk_dim ** -0.5
    h, w = hh // n_win, ww // n_win
    p2 = n_win * n_win
    w2 = h * w

    xw = _window_partition(x, n_win)                       # (n, p2, h, w, dim)

    # QKV projection (Pallas tiled matmul).
    qkv = linear_pallas(xw.reshape(n * p2 * h * w, dim),
                        params['qkv_w'], params['qkv_b'])
    qkv = qkv.reshape(n, p2, h, w, 2 * qk_dim + dim)
    q = qkv[..., :qk_dim]                                   # (n, p2, h, w, qk)
    kv = qkv[..., qk_dim:]                                  # (n, p2, h, w, qk+dim)

    q_pix = q.reshape(n, p2, w2, qk_dim)
    kv_pix = kv.reshape(n, p2, w2, qk_dim + dim)            # identity kv_down

    # Region-level routing (pure JAX: needs top-k).
    q_win = q.mean(axis=(2, 3))                             # (n, p2, qk)
    k_win = kv[..., :qk_dim].mean(axis=(2, 3))              # (n, p2, qk)
    attn_logit = jnp.einsum('npc,nqc->npq', q_win * scale, k_win)
    topk_logit, r_idx = lax.top_k(attn_logit, topk)         # (n, p2, topk)
    _r_weight = jax.nn.softmax(topk_logit, axis=-1)         # unused: mul_weight='none'

    # LePE on V over the full image (XLA depthwise conv).
    v_img = _window_merge(kv[..., qk_dim:], n_win, h, w)    # (n, H, W, dim)
    lepe = depthwise_conv3x3_nhwc(v_img, params['lepe_w'], params['lepe_b'])

    # Routed fine-grained attention (Pallas: gather + online softmax).
    out_heads = routed_attention(q_pix, kv_pix, r_idx,
                                 num_heads=num_heads, qk_dim=qk_dim, dim=dim,
                                 scale=scale)               # (n*p2, m, w2, dv)

    out = out_heads.transpose(0, 2, 1, 3).reshape(n, p2, w2, dim)
    out = _window_merge(out.reshape(n, p2, h, w, dim), n_win, h, w)
    out = out + lepe

    # Output projection wo (Pallas tiled matmul).
    out = linear_pallas(out.reshape(n * hh * ww, dim),
                        params['wo_w'], params['wo_b'])
    return out.reshape(n, hh, ww, dim)


# ---------------------------------------------------------------------------
# Pure-JAX reference (mirrors the PyTorch module op-by-op)
# ---------------------------------------------------------------------------

def reference_forward(x, params, *, n_win, num_heads, topk, qk_dim=None):
    n, hh, ww, dim = x.shape
    qk_dim = qk_dim or dim
    scale = qk_dim ** -0.5
    h, w = hh // n_win, ww // n_win
    p2 = n_win * n_win
    w2 = h * w
    dqk = qk_dim // num_heads
    dv = dim // num_heads

    xw = _window_partition(x, n_win)
    qkv = xw @ params['qkv_w'].T + params['qkv_b']
    q = qkv[..., :qk_dim]
    kv = qkv[..., qk_dim:]
    q_pix = q.reshape(n, p2, w2, qk_dim)
    kv_pix = kv.reshape(n, p2, w2, qk_dim + dim)

    q_win = q.mean(axis=(2, 3))
    k_win = kv[..., :qk_dim].mean(axis=(2, 3))
    logit = jnp.einsum('npc,nqc->npq', q_win * scale, k_win)
    _topv, r_idx = lax.top_k(logit, topk)

    # KVGather (mul_weight='none').
    n_idx = jnp.arange(n)[:, None, None]
    kv_sel = kv_pix[n_idx, r_idx]                            # (n, p2, topk, w2, ckv)
    k_sel = kv_sel[..., :qk_dim]
    v_sel = kv_sel[..., qk_dim:]

    k_h = k_sel.reshape(n, p2, topk, w2, num_heads, dqk)
    k_h = k_h.transpose(0, 1, 4, 2, 3, 5).reshape(n * p2, num_heads, topk * w2, dqk)
    v_h = v_sel.reshape(n, p2, topk, w2, num_heads, dv)
    v_h = v_h.transpose(0, 1, 4, 2, 3, 5).reshape(n * p2, num_heads, topk * w2, dv)
    q_h = q_pix.reshape(n, p2, w2, num_heads, dqk)
    q_h = q_h.transpose(0, 1, 3, 2, 4).reshape(n * p2, num_heads, w2, dqk)

    attn = jnp.einsum('bmqd,bmkd->bmqk', q_h * scale, k_h)
    attn = jax.nn.softmax(attn, axis=-1)
    out = jnp.einsum('bmqk,bmkd->bmqd', attn, v_h)           # (n*p2, m, w2, dv)
    out = out.transpose(0, 2, 1, 3).reshape(n, p2, w2, dim)
    out = _window_merge(out.reshape(n, p2, h, w, dim), n_win, h, w)

    v_img = _window_merge(kv[..., qk_dim:], n_win, h, w)
    lepe = depthwise_conv3x3_nhwc(v_img, params['lepe_w'], params['lepe_b'])
    out = out + lepe
    out = out @ params['wo_w'].T + params['wo_b']
    return out


# ---------------------------------------------------------------------------
# Test
# ---------------------------------------------------------------------------

if __name__ == "__main__":
    key = jax.random.PRNGKey(0)
    keys = jax.random.split(key, 8)

    N, H_IMG, W_IMG = 2, 16, 16
    DIM = 128
    QK_DIM = DIM
    NUM_HEADS = 4
    N_WIN = 2
    TOPK = 2

    x = jax.random.normal(keys[0], (N, H_IMG, W_IMG, DIM), dtype=jnp.float32)

    def uniform(k, shape, fan_in):
        bound = 1.0 / float(fan_in) ** 0.5
        return jax.random.uniform(k, shape, jnp.float32, -bound, bound)

    params = {
        'qkv_w': uniform(keys[1], (2 * QK_DIM + DIM, DIM), DIM),
        'qkv_b': uniform(keys[2], (2 * QK_DIM + DIM,), DIM),
        'wo_w': uniform(keys[3], (DIM, DIM), DIM),
        'wo_b': uniform(keys[4], (DIM,), DIM),
        'lepe_w': uniform(keys[5], (DIM, 1, 3, 3), 9),
        'lepe_b': uniform(keys[6], (DIM,), 9),
    }

    out = bi_level_routing_attention_forward(
        x, params, n_win=N_WIN, num_heads=NUM_HEADS, topk=TOPK, qk_dim=QK_DIM)
    out = jax.block_until_ready(out)

    ref = reference_forward(
        x, params, n_win=N_WIN, num_heads=NUM_HEADS, topk=TOPK, qk_dim=QK_DIM)

    assert out.shape == (N, H_IMG, W_IMG, DIM)
    max_err = float(jnp.max(jnp.abs(out - ref)))
    assert jnp.allclose(out, ref, atol=2e-4, rtol=2e-4), f"max abs err {max_err}"

    print("KERNEL_OK")
</pallas_src>

<mosaic_0001>
module attributes {stable_mosaic.version = 11 : i64} {
  func.func @_matmul_bias_kernel(%arg0: i32, %arg1: memref<256x128xf32, #tpu.memory_space<vmem>>, %arg2: memref<128x384xf32, #tpu.memory_space<vmem>>, %arg3: memref<1x384xf32, #tpu.memory_space<vmem>>, %arg4: memref<256x384xf32, #tpu.memory_space<vmem>>) attributes {dimension_semantics = [#tpu.dimension_semantics<parallel>], iteration_bounds = array<i64: 2>, scalar_prefetch = 0 : i64, scratch_operands = 0 : i64, tpu.core_type = #tpu.core_type<tc>, window_params = [{transform_indices = @transform_0, window_bounds = array<i64: 256, 128>}, {pipeline_mode = #tpu.pipeline_mode<synchronous>, transform_indices = @transform_1, window_bounds = array<i64: 128, 384>}, {pipeline_mode = #tpu.pipeline_mode<synchronous>, transform_indices = @transform_2, window_bounds = array<i64: 1, 384>}, {transform_indices = @transform_3, window_bounds = array<i64: 256, 384>}]} {
    %c0 = arith.constant 0 : index
    %c0_0 = arith.constant 0 : index
    %0 = vector.load %arg1[%c0, %c0_0] : memref<256x128xf32, #tpu.memory_space<vmem>>, vector<256x128xf32>
    %c0_1 = arith.constant 0 : index
    %c0_2 = arith.constant 0 : index
    %1 = vector.load %arg2[%c0_1, %c0_2] : memref<128x384xf32, #tpu.memory_space<vmem>>, vector<128x384xf32>
    %cst = arith.constant dense<0.000000e+00> : vector<256x384xf32>
    %2 = tpu.matmul %0, %1, %cst {dimension_numbers = #tpu.dot_dimension_numbers<[1], [0], [0], [1], [0, 0, 1, 1], [], []>} : vector<256x128xf32>, vector<128x384xf32>, vector<256x384xf32> -> vector<256x384xf32>
    %c0_3 = arith.constant 0 : index
    %c0_4 = arith.constant 0 : index
    %3 = vector.load %arg3[%c0_3, %c0_4] : memref<1x384xf32, #tpu.memory_space<vmem>>, vector<1x384xf32>
    %4 = vector.broadcast %3 : vector<1x384xf32> to vector<256x384xf32>
    %5 = arith.addf %2, %4 : vector<256x384xf32>
    %c0_5 = arith.constant 0 : index
    %c0_6 = arith.constant 0 : index
    %6 = vector.load %arg4[%c0_5, %c0_6] : memref<256x384xf32, #tpu.memory_space<vmem>>, vector<256x384xf32>
    tpu.vector_store %arg4[%c0_5, %c0_6], %5 {strides = array<i32>} : memref<256x384xf32, #tpu.memory_space<vmem>>, vector<256x384xf32>,
    return
  }
  func.func @transform_0(%arg0: i32) -> (i32, i32) {
    %c0_i32 = arith.constant 0 : i32
    %c0_i32_0 = arith.constant 0 : i32
    return %arg0, %c0_i32 : i32, i32
  }
  func.func @transform_1(%arg0: i32) -> (i32, i32) {
    %c0_i32 = arith.constant 0 : i32
    %c0_i32_0 = arith.constant 0 : i32
    %c0_i32_1 = arith.constant 0 : i32
    return %c0_i32, %c0_i32_0 : i32, i32
  }
  func.func @transform_2(%arg0: i32) -> (i32, i32) {
    %c0_i32 = arith.constant 0 : i32
    %c0_i32_0 = arith.constant 0 : i32
    %c0_i32_1 = arith.constant 0 : i32
    return %c0_i32, %c0_i32_0 : i32, i32
  }
  func.func @transform_3(%arg0: i32) -> (i32, i32) {
    %c0_i32 = arith.constant 0 : i32
    %c0_i32_0 = arith.constant 0 : i32
    return %arg0, %c0_i32 : i32, i32
  }
}

</mosaic_0001>

<bundles_post_ra>
// kernel: tpu_custom_call.1
= control target key start
LH: loop header
LB: loop body
LE: loop exit
PB: predicated region body
PF: predicated region fallthrough
CT: control target
= control target key end

     0   :  { %8 = vsyncpa [#allocation3], 0  ;;  %s1881_s0 = inlined_call_operand.hbm [shape: f32[512,128], index: 0, kind: input, shape index: {}]   ;;  %s1882_s1 = inlined_call_operand.hbm [shape: f32[128,384], index: 1, kind: input, shape index: {}]   ;;  %s1883_s2 = inlined_call_operand.vmem [shape: f32[1,384], index: 2, kind: input, shape index: {}]   ;;  %s1884_s3 = inlined_call_operand.hbm [shape: f32[512,384], index: 3, kind: output, shape index: {}]  }
   0x1   :  { %10 = vsyncpa [#allocation3 + $0x1], 0 }
   0x2   :  { %11 = vsyncpa [#allocation6], 0 }
   0x3   :  { %12 = vsyncpa [#allocation4], 0 }
   0x4   :  { %14 = vsyncpa [#allocation4 + $0x1], 0  ;;  %s1375_s12 = smov 0   ;;  %s1377_s13 = smov 0  }
   0x5   :  { %s1379_s14 = smov 0   ;;  %s1381_s15 = smov 0  }
   0x6 LB: > { %s1396_s16 = sadd.s32 4294967295, %s1343_s15   ;;  %s979_s17 = sadd.s32 4294967294, %s1343_s15   ;;  %s1343_s15 = sphi %s1381_s15, %s1906_s15   ;;  %s1339_s14 = sphi %s1379_s14, %s1905_s14   ;;  %s1335_s13 = sphi %s1377_s13, %s1904_s13   ;;  %s1331_s12 = sphi %s1375_s12, %s1903_s12  }
   0x7   : > { %p40_p0 = scmp.ne.s32.totalorder %s1335_s13, %s1331_s12  ;;  %p1885_p1 = scmp.eq.s32.totalorder %s1396_s16, 0 }
   0x8   : > { %p112_p3 = scmp.eq.s32.totalorder %s979_s17, 1  ;;  %p980_p5 = scmp.ge.s32.totalorder %s1343_s15, 1 }
   0x9   : > { %p1405_p4 = por %p1885_p1, %p40_p0  ;;  %p119_p7 = scmp.lt.s32.totalorder %s1343_s15, 3 }
   0xa   : > { %p1410_p6 = por %p112_p3, %p40_p0  ;;  %s1345_s21 = smov [#allocation5]  }
   0xb   : > { %s1889_s18 = scalar_select %p1405_p4, 1, 0 }
   0xc   : > { %s1890_s19 = scalar_select %p1410_p6, 1, 0 }
   0xd   : > { %p1415_p8 = pnand %p980_p5, %p119_p7  ;;  %s131_s22 = sshll.u32 %s1345_s21, 4  ;;  %s132_s22 = int_to_ptr.vmem [resolvable:$true] %s131_s22 }
   0xe   : > { %s1429_s24 = sadd.s32 1, %s1343_s15   ;;  %s27_s25 = sadd.s32 1, %s1339_s14 }
   0xf   : > { %s1891_s20 = scalar_select %p1415_p8, 1, 0 }
  0x10   : > { %p1165_p9 = pneg %p1415_p8  ;;  %s24_s26 = ssub.s32 %s1343_s15, %s1429_s24 }
  0x11   : > { %s1232_s27 = scalar_lea.vmem %s132_s22, 6144  ;;  %p1240_p5 = scmp.lt.s32.totalorder %s132_s22, %s132_s22 }
  0x12   : > { %p1424_p11 = pnand %p1165_p9, %p1885_p1  ;;  %p1233_p13 = scmp.ne.s32.totalorder %s132_s22, %s1232_s27 }
  0x13   : > { %p1241_p7 = scmp.lt.s32.totalorder %s1232_s27, %s1232_s27 }
  0x14   : > { %p1223_p12 = pneg %p1424_p11 }
  0x15   : > { %p1242_p10 = por %p1241_p7, %p1240_p5 }
  0x16   : > { %p1235_p0 = pnand %p1233_p13, %p1223_p12 }
  0x18   : > { %p1236_p3 = pneg %p1235_p0 }
  0x1a   : > { %p1243_p2 = pnand %p1242_p10, %p1236_p3 }
  0x1c   : > { %1246 = shalt.err (!%p1243_p2)
}
  0x1d   : > { %s1346_s28 = smov 384   ;;  %s1347_s29 = smov 24  }
  0x1e   : > { %1168 = dma.hbm_to_vmem [thread:$0]  (!%p1424_p11), %s1882_s1, 6144, %s132_s22, [#allocation6], %s1346_s28, %s1346_s28, %s1347_s29  }
  0x1f   : > { %p25_p9 = scmp.eq.s32.totalorder %s24_s26, 0  ;;  %p34_p12 = scmp.ne.s32.totalorder %s1339_s14, %s1335_s13 }
  0x20   : > { %p35_p10 = scmp.eq.s32.totalorder %s1343_s15, 0  ;;  %p1178_p2 = scmp.lt.s32.totalorder %s1343_s15, 2 }
  0x21   : > { %s1446_s5 = scalar_select %p25_p9, %s1339_s14, %s27_s25  }
  0x22   : > { %p36_p13 = por %p35_p10, %p34_p12  ;;  %p1893_p0 = scmp.eq.s32.totalorder %s1396_s16, 1 }
  0x23   : > { %s148_s7 = sand.u32 1, %s1339_s14   ;;  %s994_s8 = sshll.u32 %s1343_s15, 12 }
  0x24   : > { %p1450_p3 = por %p1893_p0, %p34_p12  ;;  %s983_s9 = sshll.u32 %s148_s7, 8 }
  0x25   : > { %s1459_s17 = scalar_lea.hbm %s1881_s0, %s994_s8  ;;  %s152_s21 = scalar_lea.vmem [#allocation2], %s983_s9 }
  0x26   : > { %s1894_s6 = scalar_select %p1450_p3, 1, 0 }
  0x27   : > { %s159_s22 = sshll.u32 %s152_s21, 4  ;;  %p1461_p11 = pnand %p1178_p2, %p36_p13  ;;  %s1465_s22 = int_to_ptr.vmem [resolvable:$true] %s159_s22 }
  0x28   : > { %s1467_s25 = scalar_lea.sflag [#allocation3], %s148_s7  ;;  %s1247_s26 = scalar_lea.hbm %s1459_s17, 4096 }
  0x29   : > { %p1248_p5 = scmp.ne.s32.totalorder %s1459_s17, %s1247_s26  ;;  %p1249_p7 = pneg %p1461_p11 }
  0x2a   : > { %s1252_s29 = scalar_lea.hbm %s1881_s0, 8192  ;;  %p1253_p10 = scmp.lt.s32.totalorder %s1459_s17, %s1881_s0 }
  0x2b   : > { %p1250_p9 = pnand %p1249_p7, %p1248_p5  ;;  %p1254_p2 = scmp.lt.s32.totalorder %s1252_s29, %s1247_s26 }
  0x2d   : > { %p1251_p12 = pneg %p1250_p9  ;;  %p1255_p13 = por %p1254_p2, %p1253_p10 }
  0x2f   : > { %p1256_p0 = pnand %p1255_p13, %p1251_p12 }
  0x31   : > { %1259 = shalt.err (!%p1256_p0)
}
  0x32   : > { %s1260_s7 = scalar_lea.vmem %s1465_s22, 4096  ;;  %s1348_s8 = smov [#allocation2]  }
  0x33   : > { %p1261_p1 = scmp.ne.s32.totalorder %s1465_s22, %s1260_s7  ;;  %s1265_s9 = sshll.u32 %s1348_s8, 4  ;;  %s1266_s9 = int_to_ptr.vmem [resolvable:$false] %s1265_s9 }
  0x34   : > { %s1267_s10 = scalar_lea.vmem %s1266_s9, 8192  ;;  %p1268_p9 = scmp.lt.s32.totalorder %s1465_s22, %s1266_s9 }
  0x35   : > { %p1263_p6 = pnand %p1261_p1, %p1249_p7  ;;  %p1269_p3 = scmp.lt.s32.totalorder %s1267_s10, %s1260_s7 }
  0x37   : > { %p1264_p5 = pneg %p1263_p6  ;;  %p1270_p4 = por %p1269_p3, %p1268_p9 }
  0x39   : > { %p1271_p8 = pnand %p1270_p4, %p1264_p5 }
  0x3b   : > { %1274 = shalt.err (!%p1271_p8)
}
  0x3c   : > { %s1349_s11 = smov 128   ;;  %s1350_s21 = smov 8  }
  0x3d   : > { %1172 = dma.hbm_to_vmem [thread:$0]  (!%p1461_p11), %s1459_s17, 4096, %s1465_s22, %s1467_s25, %s1349_s11, %s1349_s11, %s1350_s21  }
  0x3e   : > { %p1896_p1 = scmp.ne.s32.totalorder %s1891_s20, 0 }
  0x3f   : > { %s1491_s26 = sand.u32 (!%p1896_p1), 1, %s1335_s13   ;;  %p1897_p4 = scmp.ne.s32.totalorder (!%p1896_p1), %s1889_s18, 0 }
  0x40   : > { %171 = sbr.rel (%p1896_p1) target bundleno = 411 (0x19b), region = 32  ;;  %s987_s27 = sshll.u32 (!%p1896_p1), %s1491_s26, 8 }
  0x41   : > { %s174_s28 = scalar_lea.sflag (!%p1896_p1), [#allocation3], %s1491_s26  ;;  %s1495_s29 = scalar_lea.vmem (!%p1896_p1), [#allocation2], %s987_s27 }
  0x45   : > { %1318 = dma.done.wait (%p1897_p4), %s174_s28, 4096  }
  0x46   : > { %1320 = vsyncadd (%p1897_p4), %s174_s28, 4294963200  ;;  %p1898_p6 = scmp.eq.s32.totalorder %s1396_s16, 0 }
  0x48   : > { %1322 = dma.done.wait (%p1898_p6), [#allocation6], 6144   ;;  %p1899_p8 = pmov %p1898_p6 }
  0x49   : > { %v1351_v0 = vmov 0.0   ;;  %v284_v1 = vld [vmem:[#allocation5 + $0x170] sm:$0xff]  ;;  %v283_v2 = vld [vmem:[#allocation5 + $0x168] sm:$0xff]  ;;  %v281_v3 = vld [vmem:[#allocation5 + $0x158] sm:$0xff]  ;;  %s1155_s17 = smul.u32 768, %s1491_s26  ;;  %s882_s7 = scalar_lea.sflag [#allocation4], %s1491_s26 }
  0x4a   : > { %1324 = vsyncadd (%p1899_p8), [#allocation6], 4294961152  ;;  %367 = vmatprep.mubr.f32.mxu0 %v1351_v0  ;;  %511 = vmatprep.mubr.f32.mxu1 %v1351_v0  ;;  %v280_v4 = vld [vmem:[#allocation5 + $0x150] sm:$0xff]  ;;  %v278_v5 = vld [vmem:[#allocation5 + $0x140] sm:$0xff]  ;;  %s1156_s23 = smul.u32 12288, %s1396_s16  ;;  %p1900_p11 = scmp.ne.s32.totalorder %s1894_s6, 0 }
  0x4b   : > { %303 = vmatprep.subr.mxu0 %v284_v1  ;;  %1123 = vmatprep.subr.mxu1 %v284_v1  ;;  %v277_v6 = vld [vmem:[#allocation5 + $0x138] sm:$0xff]  ;;  %v275_v7 = vld [vmem:[#allocation5 + $0x128] sm:$0xff]  ;;  %v274_v8 = vld [vmem:[#allocation5 + $0x120] sm:$0xff]  ;;  %s1635_s22 = scalar_lea.vmem [#allocation7], %s1155_s17  ;;  %s1352_s9 = smov [#allocation7]  }
  0x4c   : > { %304 = vmatpush1.msra.mxu0 %v283_v2  ;;  %1139 = vmatpush1.msra.mxu1 %v283_v2  ;;  %v272_v9 = vld [vmem:[#allocation5 + $0x110] sm:$0xff]  ;;  %v271_v10 = vld [vmem:[#allocation5 + $0x108] sm:$0xff]  ;;  %v269_v11 = vld [vmem:[#allocation5 + $0xf8] sm:$0xff]  ;;  %s896_s25 = sshll.u32 %s1635_s22, 4  ;;  %s1832_s4 = scalar_lea.hbm %s1884_s3, %s1156_s23  ;;  %s1834_s25 = int_to_ptr.vmem [resolvable:$true] %s896_s25 }
  0x4d   : > { %305 = vmatprep.subr.mxu0 %v281_v3  ;;  %1124 = vmatprep.subr.mxu1 %v281_v3  ;;  %v268_v12 = vld [vmem:[#allocation5 + $0xf0] sm:$0xff]  ;;  %v266_v13 = vld [vmem:[#allocation5 + $0xe0] sm:$0xff]  ;;  %v265_v14 = vld [vmem:[#allocation5 + $0xd8] sm:$0xff]  ;;  %s1275_s8 = scalar_lea.vmem %s1834_s25, 12288  ;;  %s1279_s10 = sshll.u32 %s1352_s9, 4  ;;  %s1280_s10 = int_to_ptr.vmem [resolvable:$false] %s1279_s10 }
  0x4e   : > { %306 = vmatpush1.msra.mxu0 %v280_v4  ;;  %1140 = vmatpush1.msra.mxu1 %v280_v4  ;;  %v263_v15 = vld [vmem:[#allocation5 + $0xc8] sm:$0xff]  ;;  %v262_v16 = vld [vmem:[#allocation5 + $0xc0] sm:$0xff]  ;;  %v260_v17 = vld [vmem:[#allocation5 + $0xb0] sm:$0xff]  ;;  %p1276_p3 = scmp.ne.s32.totalorder %s1834_s25, %s1275_s8  ;;  %s1281_s11 = scalar_lea.vmem %s1280_s10, 24576 }
  0x4f   : > { %307 = vmatprep.subr.mxu0 %v278_v5  ;;  %1125 = vmatprep.subr.mxu1 %v278_v5  ;;  %v259_v18 = vld [vmem:[#allocation5 + $0xa8] sm:$0xff]  ;;  %v257_v19 = vld [vmem:[#allocation5 + $0x98] sm:$0xff]  ;;  %v256_v20 = vld [vmem:[#allocation5 + $0x90] sm:$0xff]  ;;  %p1282_p10 = scmp.lt.s32.totalorder %s1834_s25, %s1280_s10  ;;  %p1283_p2 = scmp.lt.s32.totalorder %s1281_s11, %s1275_s8 }
  0x50   : > { %308 = vmatpush1.msra.mxu0 %v277_v6  ;;  %1141 = vmatpush1.msra.mxu1 %v277_v6  ;;  %v254_v21 = vld [vmem:[#allocation5 + $0x80] sm:$0xff]  ;;  %v253_v22 = vld [vmem:[#allocation5 + $0x78] sm:$0xff]  ;;  %v251_v23 = vld [vmem:[#allocation5 + $0x68] sm:$0xff]  ;;  %p1277_p7 = pnand %p1276_p3, %p1900_p11 }
  0x51   : > { %309 = vmatprep.subr.mxu0 %v275_v7  ;;  %1126 = vmatprep.subr.mxu1 %v275_v7  ;;  %v250_v24 = vld [vmem:[#allocation5 + $0x60] sm:$0xff]  ;;  %v248_v25 = vld [vmem:[#allocation5 + $0x50] sm:$0xff]  ;;  %v247_v26 = vld [vmem:[#allocation5 + $0x48] sm:$0xff]  ;;  %p1284_p13 = por %p1283_p2, %p1282_p10 }
  0x52   : > { %310 = vmatpush1.msra.mxu0 %v274_v8  ;;  %1142 = vmatpush1.msra.mxu1 %v274_v8  ;;  %v245_v27 = vld [vmem:[#allocation5 + $0x38] sm:$0xff]  ;;  %v244_v28 = vld [vmem:[#allocation5 + $0x30] sm:$0xff]  ;;  %v242_v29 = vld [vmem:[#allocation5 + $0x20] sm:$0xff]  ;;  %p1278_p12 = pneg %p1277_p7 }
  0x53   : > { %311 = vmatprep.subr.mxu0 %v272_v9  ;;  %1127 = vmatprep.subr.mxu1 %v272_v9  ;;  %v241_v30 = vld [vmem:[#allocation5 + $0x18] sm:$0xff]  ;;  %v239_v31 = vld [vmem:[#allocation5 + $0x8] sm:$0xff]  ;;  %v238_v32 = vld [vmem:[#allocation5] sm:$0xff] }
  0x54   : > { %312 = vmatpush1.msra.mxu0 %v271_v10  ;;  %1143 = vmatpush1.msra.mxu1 %v271_v10  ;;  %v1508_v33 = vld [vmem:[%s1495_s29] sm:$0xff]  ;;  %v285_v35 = vld [vmem:[#allocation5 + $0x178] sm:$0xff]  ;;  %v1517_v37 = vld [vmem:[%s1495_s29 + $0x8] sm:$0xff]  ;;  %p1285_p0 = pnand %p1284_p13, %p1278_p12 }
  0x55   : > { %313 = vmatprep.subr.mxu0 %v269_v11  ;;  %1128 = vmatprep.subr.mxu1 %v269_v11  ;;  %v1511_v34 = vld [vmem:[%s1495_s29 + $0xc0] sm:$0xff]  ;;  %v1521_v38 = vld [vmem:[%s1495_s29 + $0xc8] sm:$0xff]  ;;  %v276_v40 = vld [vmem:[#allocation5 + $0x130] sm:$0xff] }
  0x56   : > { %314 = vmatpush1.msra.mxu0 %v268_v12  ;;  %1144 = vmatpush1.msra.mxu1 %v268_v12  ;;  %v282_v36 = vld [vmem:[#allocation5 + $0x160] sm:$0xff]  ;;  %v279_v39 = vld [vmem:[#allocation5 + $0x148] sm:$0xff]  ;;  %v1526_v41 = vld [vmem:[%s1495_s29 + $0x10] sm:$0xff] }
  0x57   : > { %315 = vmatprep.subr.mxu0 %v266_v13  ;;  %1129 = vmatprep.subr.mxu1 %v266_v13  ;;  %v1530_v42 = vld [vmem:[%s1495_s29 + $0xd0] sm:$0xff]  ;;  %v273_v43 = vld [vmem:[#allocation5 + $0x118] sm:$0xff]  ;;  %v270_v44 = vld [vmem:[#allocation5 + $0x100] sm:$0xff] }
  0x58   : > { %316 = vmatpush1.msra.mxu0 %v265_v14  ;;  %1145 = vmatpush1.msra.mxu1 %v265_v14  ;;  %v1536_v45 = vld [vmem:[%s1495_s29 + $0x18] sm:$0xff]  ;;  %v267_v47 = vld [vmem:[#allocation5 + $0xe8] sm:$0xff]  ;;  %v264_v48 = vld [vmem:[#allocation5 + $0xd0] sm:$0xff] }
  0x59   : > { %317 = vmatprep.subr.mxu0 %v263_v15  ;;  %1130 = vmatprep.subr.mxu1 %v263_v15  ;;  %v1540_v46 = vld [vmem:[%s1495_s29 + $0xd8] sm:$0xff]  ;;  %v210_v49 = vld [vmem:[%s1495_s29 + $0x20] sm:$0xff]  ;;  %v211_v53 = vld [vmem:[%s1495_s29 + $0x28] sm:$0xff] }
  0x5a   : > { %318 = vmatpush1.msra.mxu0 %v262_v16  ;;  %1146 = vmatpush1.msra.mxu1 %v262_v16  ;;  %v1548_v50 = vld [vmem:[%s1495_s29 + $0xe0] sm:$0xff]  ;;  %v261_v51 = vld [vmem:[#allocation5 + $0xb8] sm:$0xff]  ;;  %v1555_v54 = vld [vmem:[%s1495_s29 + $0xe8] sm:$0xff] }
  0x5b   : > { %319 = vmatprep.subr.mxu0 %v260_v17  ;;  %1131 = vmatprep.subr.mxu1 %v260_v17  ;;  %v258_v52 = vld [vmem:[#allocation5 + $0xa0] sm:$0xff]  ;;  %v255_v55 = vld [vmem:[#allocation5 + $0x88] sm:$0xff]  ;;  %v252_v56 = vld [vmem:[#allocation5 + $0x70] sm:$0xff] }
  0x5c   : > { %320 = vmatpush1.msra.mxu0 %v259_v18  ;;  %1147 = vmatpush1.msra.mxu1 %v259_v18  ;;  %v212_v57 = vld [vmem:[%s1495_s29 + $0x30] sm:$0xff]  ;;  %v249_v59 = vld [vmem:[#allocation5 + $0x58] sm:$0xff]  ;;  %v246_v60 = vld [vmem:[#allocation5 + $0x40] sm:$0xff]  ;;  %v288_v18 = vlaneseq }
  0x5d   : > { %321 = vmatprep.subr.mxu0 %v257_v19  ;;  %1132 = vmatprep.subr.mxu1 %v257_v19  ;;  %v1562_v58 = vld [vmem:[%s1495_s29 + $0xf0] sm:$0xff]  ;;  %v213_v61 = vld [vmem:[%s1495_s29 + $0x38] sm:$0xff]  ;;  %v243_v63 = vld [vmem:[#allocation5 + $0x28] sm:$0xff] }
  0x5e   : > { %322 = vmatpush1.msra.mxu0 %v256_v20  ;;  %1148 = vmatpush1.msra.mxu1 %v256_v20  ;;  %v1569_v62 = vld [vmem:[%s1495_s29 + $0xf8] sm:$0xff]  ;;  %v240_v1 = vld [vmem:[#allocation5 + $0x10] sm:$0xff]  ;;  %v214_v2 = vld [vmem:[%s1495_s29 + $0x40] sm:$0xff]  ;;  %v1617_v19 = vshrl.u32 %v288_v18, 7 }
  0x5f   : > { %323 = vmatprep.subr.mxu0 %v254_v21  ;;  %1133 = vmatprep.subr.mxu1 %v254_v21  ;;  %v215_v3 = vld [vmem:[%s1495_s29 + $0x48] sm:$0xff]  ;;  %v216_v4 = vld [vmem:[%s1495_s29 + $0x50] sm:$0xff]  ;;  %v217_v5 = vld [vmem:[%s1495_s29 + $0x58] sm:$0xff] }
  0x60   : > { %324 = vmatpush1.msra.mxu0 %v253_v22  ;;  %1149 = vmatpush1.msra.mxu1 %v253_v22  ;;  %v218_v6 = vld [vmem:[%s1495_s29 + $0x60] sm:$0xff]  ;;  %v219_v7 = vld [vmem:[%s1495_s29 + $0x68] sm:$0xff]  ;;  %v220_v8 = vld [vmem:[%s1495_s29 + $0x70] sm:$0xff]  ;;  %v290_v20 = vsub.s32 0, %v1617_v19  ;;  %v294_v22 = vsub.s32 1, %v1617_v19 }
  0x61   : > { %325 = vmatprep.subr.mxu0 %v251_v23  ;;  %1134 = vmatprep.subr.mxu1 %v251_v23  ;;  %v221_v9 = vld [vmem:[%s1495_s29 + $0x78] sm:$0xff]  ;;  %v222_v10 = vld [vmem:[%s1495_s29 + $0x80] sm:$0xff]  ;;  %v223_v11 = vld [vmem:[%s1495_s29 + $0x88] sm:$0xff] }
  0x62   : > { %326 = vmatpush1.msra.mxu0 %v250_v24  ;;  %1150 = vmatpush1.msra.mxu1 %v250_v24  ;;  %v224_v12 = vld [vmem:[%s1495_s29 + $0x90] sm:$0xff]  ;;  %v225_v13 = vld [vmem:[%s1495_s29 + $0x98] sm:$0xff]  ;;  %v226_v14 = vld [vmem:[%s1495_s29 + $0xa0] sm:$0xff] }
  0x63   : > { %327 = vmatprep.subr.mxu0 %v248_v25  ;;  %1135 = vmatprep.subr.mxu1 %v248_v25  ;;  %v227_v15 = vld [vmem:[%s1495_s29 + $0xa8] sm:$0xff]  ;;  %v228_v16 = vld [vmem:[%s1495_s29 + $0xb0] sm:$0xff]  ;;  %v229_v17 = vld [vmem:[%s1495_s29 + $0xb8] sm:$0xff] }
  0x64   : > { %328 = vmatpush1.msra.mxu0 %v247_v26  ;;  %1151 = vmatpush1.msra.mxu1 %v247_v26  ;;  %v1623_v21 = vld [vmem:[%s1883_s2] sm:$0x7] }
  0x65   : > { %329 = vmatprep.subr.mxu0 %v245_v27  ;;  %1136 = vmatprep.subr.mxu1 %v245_v27  ;;  %v1631_v23 = vrot.slane %v1623_v21, %v294_v22 }
  0x66   : > { %330 = vmatpush1.msra.mxu0 %v244_v28  ;;  %1152 = vmatpush1.msra.mxu1 %v244_v28 }
  0x67   : > { %331 = vmatprep.subr.mxu0 %v242_v29  ;;  %1137 = vmatprep.subr.mxu1 %v242_v29 }
  0x68   : > { %332 = vmatpush1.msra.mxu0 %v241_v30  ;;  %1153 = vmatpush1.msra.mxu1 %v241_v30 }
  0x69   : > { %333 = vmatprep.subr.mxu0 %v239_v31  ;;  %1138 = vmatprep.subr.mxu1 %v239_v31 }
  0x6a   : > { %334 = vmatpush1.msra.mxu0 %v238_v32  ;;  %1154 = vmatpush1.msra.mxu1 %v238_v32 }
  0x6b   : > { %368 = vmatmul.mubr.f32.vlgmr.msra.gmra.mxu0 %v1508_v33  ;;  %512 = vmatmul.mubr.f32.vlgmr.msra.gmra.mxu1 %v1511_v34 }
  0x6c   : > { %1043 = vmatprep.subr.mxu1 %v285_v35  ;;  %373 = vmatprep.mubr.f32.mxu0 %v1351_v0 }
  0x6d   : > { %1044 = vmatpush3.msra.mxu1 %v285_v35  ;;  %517 = vmatprep.mubr.f32.mxu1 %v1351_v0 }
  0x6e   : > { %1045 = vmatprep.subr.mxu1 %v282_v36 }
  0x6f   : > { %1046 = vmatpush3.msra.mxu1 %v282_v36  ;;  %374 = vmatmul.mubr.f32.gmra.mxu0 %v1517_v37 }
  0x70   : > { %518 = vmatmul.mubr.f32.gmra.mxu1 %v1521_v38  ;;  %1047 = vmatprep.subr.mxu1 %v279_v39 }
  0x71   : > { %1048 = vmatpush3.msra.mxu1 %v279_v39  ;;  %379 = vmatprep.mubr.f32.mxu0 %v1351_v0 }
  0x72   : > { %1049 = vmatprep.subr.mxu1 %v276_v40  ;;  %523 = vmatprep.mubr.f32.mxu1 %v1351_v0 }
  0x73   : > { %1050 = vmatpush3.msra.mxu1 %v276_v40  ;;  %380 = vmatmul.mubr.f32.gmra.mxu0 %v1526_v41 }
  0x74   : > { %524 = vmatmul.mubr.f32.gmra.mxu1 %v1530_v42  ;;  %1051 = vmatprep.subr.mxu1 %v273_v43 }
  0x75   : > { %1052 = vmatpush3.msra.mxu1 %v273_v43  ;;  %385 = vmatprep.mubr.f32.mxu0 %v1351_v0 }
  0x76   : > { %1053 = vmatprep.subr.mxu1 %v270_v44  ;;  %529 = vmatprep.mubr.f32.mxu1 %v1351_v0 }
  0x77   : > { %1054 = vmatpush3.msra.mxu1 %v270_v44  ;;  %386 = vmatmul.mubr.f32.gmra.mxu0 %v1536_v45 }
  0x78   : > { %530 = vmatmul.mubr.f32.gmra.mxu1 %v1540_v46  ;;  %1055 = vmatprep.subr.mxu1 %v267_v47 }
  0x79   : > { %1056 = vmatpush3.msra.mxu1 %v267_v47  ;;  %391 = vmatprep.mubr.f32.mxu0 %v1351_v0 }
  0x7a   : > { %1057 = vmatprep.subr.mxu1 %v264_v48  ;;  %535 = vmatprep.mubr.f32.mxu1 %v1351_v0 }
  0x7b   : > { %1058 = vmatpush3.msra.mxu1 %v264_v48  ;;  %392 = vmatmul.mubr.f32.gmra.mxu0 %v210_v49 }
  0x7c   : > { %536 = vmatmul.mubr.f32.gmra.mxu1 %v1548_v50  ;;  %1059 = vmatprep.subr.mxu1 %v261_v51 }
  0x7d   : > { %1060 = vmatpush3.msra.mxu1 %v261_v51  ;;  %397 = vmatprep.mubr.f32.mxu0 %v1351_v0 }
  0x7e   : > { %1061 = vmatprep.subr.mxu1 %v258_v52  ;;  %541 = vmatprep.mubr.f32.mxu1 %v1351_v0 }
  0x7f   : > { %1062 = vmatpush3.msra.mxu1 %v258_v52  ;;  %398 = vmatmul.mubr.f32.gmra.mxu0 %v211_v53 }
  0x80   : > { %542 = vmatmul.mubr.f32.gmra.mxu1 %v1555_v54  ;;  %1063 = vmatprep.subr.mxu1 %v255_v55 }
  0x81   : > { %1064 = vmatpush3.msra.mxu1 %v255_v55  ;;  %403 = vmatprep.mubr.f32.mxu0 %v1351_v0 }
  0x82   : > { %1065 = vmatprep.subr.mxu1 %v252_v56  ;;  %547 = vmatprep.mubr.f32.mxu1 %v1351_v0 }
  0x83   : > { %1066 = vmatpush3.msra.mxu1 %v252_v56  ;;  %404 = vmatmul.mubr.f32.gmra.mxu0 %v212_v57 }
  0x84   : > { %548 = vmatmul.mubr.f32.gmra.mxu1 %v1562_v58  ;;  %1067 = vmatprep.subr.mxu1 %v249_v59 }
  0x85   : > { %1068 = vmatpush3.msra.mxu1 %v249_v59  ;;  %409 = vmatprep.mubr.f32.mxu0 %v1351_v0 }
  0x86   : > { %1069 = vmatprep.subr.mxu1 %v246_v60  ;;  %553 = vmatprep.mubr.f32.mxu1 %v1351_v0 }
  0x87   : > { %1070 = vmatpush3.msra.mxu1 %v246_v60  ;;  %410 = vmatmul.mubr.f32.gmra.mxu0 %v213_v61 }
  0x88   : > { %554 = vmatmul.mubr.f32.gmra.mxu1 %v1569_v62  ;;  %1071 = vmatprep.subr.mxu1 %v243_v63 }
  0x89   : > { %1072 = vmatpush3.msra.mxu1 %v243_v63  ;;  %415 = vmatprep.mubr.f32.mxu0 %v1351_v0 }
  0x8a   : > { %1073 = vmatprep.subr.mxu1 %v240_v1  ;;  %1075 = vmatprep.mubr.f32.mxu1 %v1508_v33 }
  0x8b   : > { %1074 = vmatpush3.msra.mxu1 %v240_v1  ;;  %416 = vmatmul.mubr.f32.gmra.mxu0 %v214_v2 }
  0x8c   : > { %1076 = vmatmul.mubr.f32.vlgmr.msra.gmra.mxu1 %v1517_v37  ;;  %421 = vmatprep.mubr.f32.mxu0 %v1351_v0 }
  0x8d   : > { %1078 = vmatprep.mubr.f32.mxu1 %v1526_v41 }
  0x8f   : > { %422 = vmatmul.mubr.f32.gmra.mxu0 %v215_v3 }
  0x90   : > { %1079 = vmatmul.mubr.f32.gmra.mxu1 %v1536_v45  ;;  %427 = vmatprep.mubr.f32.mxu0 %v1351_v0 }
  0x91   : > { %1081 = vmatprep.mubr.f32.mxu1 %v210_v49 }
  0x93   : > { %428 = vmatmul.mubr.f32.gmra.mxu0 %v216_v4 }
  0x94   : > { %1082 = vmatmul.mubr.f32.gmra.mxu1 %v211_v53  ;;  %433 = vmatprep.mubr.f32.mxu0 %v1351_v0 }
  0x95   : > { %1084 = vmatprep.mubr.f32.mxu1 %v212_v57 }
  0x97   : > { %434 = vmatmul.mubr.f32.gmra.mxu0 %v217_v5 }
  0x98   : > { %1085 = vmatmul.mubr.f32.gmra.mxu1 %v213_v61  ;;  %439 = vmatprep.mubr.f32.mxu0 %v1351_v0 }
  0x99   : > { %1087 = vmatprep.mubr.f32.mxu1 %v214_v2 }
  0x9b   : > { %440 = vmatmul.mubr.f32.gmra.mxu0 %v218_v6 }
  0x9c   : > { %1088 = vmatmul.mubr.f32.gmra.mxu1 %v215_v3  ;;  %445 = vmatprep.mubr.f32.mxu0 %v1351_v0 }
  0x9d   : > { %1090 = vmatprep.mubr.f32.mxu1 %v216_v4 }
  0x9f   : > { %446 = vmatmul.mubr.f32.gmra.mxu0 %v219_v7 }
  0xa0   : > { %1091 = vmatmul.mubr.f32.gmra.mxu1 %v217_v5  ;;  %451 = vmatprep.mubr.f32.mxu0 %v1351_v0 }
  0xa1   : > { %1093 = vmatprep.mubr.f32.mxu1 %v218_v6 }
  0xa3   : > { %452 = vmatmul.mubr.f32.gmra.mxu0 %v220_v8 }
  0xa4   : > { %1094 = vmatmul.mubr.f32.gmra.mxu1 %v219_v7  ;;  %457 = vmatprep.mubr.f32.mxu0 %v1351_v0 }
  0xa5   : > { %1096 = vmatprep.mubr.f32.mxu1 %v220_v8 }
  0xa7   : > { %458 = vmatmul.mubr.f32.gmra.mxu0 %v221_v9 }
  0xa8   : > { %1097 = vmatmul.mubr.f32.gmra.mxu1 %v221_v9  ;;  %463 = vmatprep.mubr.f32.mxu0 %v1351_v0 }
  0xa9   : > { %1099 = vmatprep.mubr.f32.mxu1 %v222_v10 }
  0xab   : > { %464 = vmatmul.mubr.f32.gmra.mxu0 %v222_v10 }
  0xac   : > { %1100 = vmatmul.mubr.f32.gmra.mxu1 %v223_v11  ;;  %469 = vmatprep.mubr.f32.mxu0 %v1351_v0 }
  0xad   : > { %1102 = vmatprep.mubr.f32.mxu1 %v224_v12 }
  0xaf   : > { %470 = vmatmul.mubr.f32.gmra.mxu0 %v223_v11 }
  0xb0   : > { %1103 = vmatmul.mubr.f32.gmra.mxu1 %v225_v13  ;;  %475 = vmatprep.mubr.f32.mxu0 %v1351_v0 }
  0xb1   : > { %1105 = vmatprep.mubr.f32.mxu1 %v226_v14 }
  0xb3   : > { %476 = vmatmul.mubr.f32.gmra.mxu0 %v224_v12 }
  0xb4   : > { %1106 = vmatmul.mubr.f32.gmra.mxu1 %v227_v15  ;;  %481 = vmatprep.mubr.f32.mxu0 %v1351_v0 }
  0xb5   : > { %1108 = vmatprep.mubr.f32.mxu1 %v228_v16 }
  0xb7   : > { %482 = vmatmul.mubr.f32.gmra.mxu0 %v225_v13 }
  0xb8   : > { %1109 = vmatmul.mubr.f32.gmra.mxu1 %v229_v17  ;;  %487 = vmatprep.mubr.f32.mxu0 %v1351_v0 }
  0xb9   : > { %1111 = vmatprep.mubr.f32.mxu1 %v1511_v34 }
  0xbb   : > { %488 = vmatmul.mubr.f32.gmra.mxu0 %v226_v14  ;;  %v298_v14 = vsub.s32 2, %v1617_v19 }
  0xbc   : > { %1112 = vmatmul.mubr.f32.gmra.mxu1 %v1521_v38  ;;  %493 = vmatprep.mubr.f32.mxu0 %v1351_v0 }
  0xbd   : > { %1114 = vmatprep.mubr.f32.mxu1 %v1530_v42 }
  0xbf   : > { %494 = vmatmul.mubr.f32.gmra.mxu0 %v227_v15 }
  0xc0   : > { %1115 = vmatmul.mubr.f32.gmra.mxu1 %v1540_v46  ;;  %499 = vmatprep.mubr.f32.mxu0 %v1351_v0 }
  0xc1   : > { %1117 = vmatprep.mubr.f32.mxu1 %v1548_v50 }
  0xc3   : > { %500 = vmatmul.mubr.f32.gmra.mxu0 %v228_v16 }
  0xc4   : > { %1118 = vmatmul.mubr.f32.gmra.mxu1 %v1555_v54  ;;  %505 = vmatprep.mubr.f32.mxu0 %v1351_v0  ;;  %v1628_v0 = vrot.slane %v1623_v21, %v290_v20 }
  0xc5   : > { %1120 = vmatprep.mubr.f32.mxu1 %v1562_v58 }
  0xc7   : > { %506 = vmatmul.mubr.f32.gmra.mxu0 %v229_v17 }
  0xc8   : > { %1121 = vmatmul.mubr.f32.gmra.mxu1 %v1569_v62 }
 0x12b   : > { %v369_v24 = vpop.f32.mrf.mxu0  ;;  %v513_v25 = vpop.f32.mrf.mxu1 }
 0x12c   : > { %v370_v26 = vadd.f32 %v369_v24, %v1628_v0  ;;  %v514_v27 = vadd.f32 %v513_v25, %v1628_v0  ;;  %v1695_v25 = vrot.slane %v1623_v21, %v298_v14 }
 0x12d   : > { %v371_v28 = vpop.f32.mrf.mxu0  ;;  %v515_v29 = vpop.f32.mrf.mxu1 }
 0x12e   : > { %785 = vst [vmem:[%s1635_s22] sm:$0xff] %v370_v26  ;;  %857 = vst [vmem:[%s1635_s22 + $0x240] sm:$0xff] %v514_v27  ;;  %v372_v30 = vadd.f32 %v371_v28, %v1631_v23  ;;  %v516_v31 = vadd.f32 %v515_v29, %v1631_v23 }
 0x12f   : > { %v375_v32 = vpop.f32.mrf.mxu0 }
 0x130   : > { %786 = vst [vmem:[%s1635_s22 + $0x8] sm:$0xff] %v372_v30  ;;  %858 = vst [vmem:[%s1635_s22 + $0x248] sm:$0xff] %v516_v31  ;;  %v376_v33 = vadd.f32 %v375_v32, %v1628_v0  ;;  %v519_v34 = vpop.f32.mrf.mxu1 }
 0x131   : > { %v520_v35 = vadd.f32 %v519_v34, %v1628_v0  ;;  %v377_v36 = vpop.f32.mrf.mxu0 }
 0x132   : > { %788 = vst [vmem:[%s1635_s22 + $0x18] sm:$0xff] %v376_v33  ;;  %v378_v37 = vadd.f32 %v377_v36, %v1631_v23  ;;  %v521_v38 = vpop.f32.mrf.mxu1 }
 0x133   : > { %860 = vst [vmem:[%s1635_s22 + $0x258] sm:$0xff] %v520_v35  ;;  %v522_v39 = vadd.f32 %v521_v38, %v1631_v23  ;;  %v381_v40 = vpop.f32.mrf.mxu0 }
 0x134   : > { %789 = vst [vmem:[%s1635_s22 + $0x20] sm:$0xff] %v378_v37  ;;  %v382_v41 = vadd.f32 %v381_v40, %v1628_v0  ;;  %v525_v42 = vpop.f32.mrf.mxu1 }
 0x135   : > { %861 = vst [vmem:[%s1635_s22 + $0x260] sm:$0xff] %v522_v39  ;;  %v526_v43 = vadd.f32 %v525_v42, %v1628_v0  ;;  %v383_v44 = vpop.f32.mrf.mxu0 }
 0x136   : > { %791 = vst [vmem:[%s1635_s22 + $0x30] sm:$0xff] %v382_v41  ;;  %v384_v45 = vadd.f32 %v383_v44, %v1631_v23  ;;  %v527_v46 = vpop.f32.mrf.mxu1 }
 0x137   : > { %863 = vst [vmem:[%s1635_s22 + $0x270] sm:$0xff] %v526_v43  ;;  %v528_v47 = vadd.f32 %v527_v46, %v1631_v23  ;;  %v387_v48 = vpop.f32.mrf.mxu0 }
 0x138   : > { %792 = vst [vmem:[%s1635_s22 + $0x38] sm:$0xff] %v384_v45  ;;  %v388_v49 = vadd.f32 %v387_v48, %v1628_v0  ;;  %v531_v50 = vpop.f32.mrf.mxu1 }
 0x139   : > { %864 = vst [vmem:[%s1635_s22 + $0x278] sm:$0xff] %v528_v47  ;;  %v532_v51 = vadd.f32 %v531_v50, %v1628_v0  ;;  %v389_v52 = vpop.f32.mrf.mxu0 }
 0x13a   : > { %794 = vst [vmem:[%s1635_s22 + $0x48] sm:$0xff] %v388_v49  ;;  %v390_v53 = vadd.f32 %v389_v52, %v1631_v23  ;;  %v533_v54 = vpop.f32.mrf.mxu1 }
 0x13b   : > { %866 = vst [vmem:[%s1635_s22 + $0x288] sm:$0xff] %v532_v51  ;;  %v534_v55 = vadd.f32 %v533_v54, %v1631_v23  ;;  %v393_v56 = vpop.f32.mrf.mxu0 }
 0x13c   : > { %795 = vst [vmem:[%s1635_s22 + $0x50] sm:$0xff] %v390_v53  ;;  %v394_v57 = vadd.f32 %v393_v56, %v1628_v0  ;;  %v537_v58 = vpop.f32.mrf.mxu1 }
 0x13d   : > { %867 = vst [vmem:[%s1635_s22 + $0x290] sm:$0xff] %v534_v55  ;;  %v538_v59 = vadd.f32 %v537_v58, %v1628_v0  ;;  %v395_v60 = vpop.f32.mrf.mxu0 }
 0x13e   : > { %797 = vst [vmem:[%s1635_s22 + $0x60] sm:$0xff] %v394_v57  ;;  %v396_v61 = vadd.f32 %v395_v60, %v1631_v23  ;;  %v539_v62 = vpop.f32.mrf.mxu1 }
 0x13f   : > { %869 = vst [vmem:[%s1635_s22 + $0x2a0] sm:$0xff] %v538_v59  ;;  %v540_v63 = vadd.f32 %v539_v62, %v1631_v23  ;;  %v399_v1 = vpop.f32.mrf.mxu0 }
 0x140   : > { %798 = vst [vmem:[%s1635_s22 + $0x68] sm:$0xff] %v396_v61  ;;  %v400_v2 = vadd.f32 %v399_v1, %v1628_v0  ;;  %v543_v3 = vpop.f32.mrf.mxu1 }
 0x141   : > { %870 = vst [vmem:[%s1635_s22 + $0x2a8] sm:$0xff] %v540_v63  ;;  %v544_v4 = vadd.f32 %v543_v3, %v1628_v0  ;;  %v401_v5 = vpop.f32.mrf.mxu0 }
 0x142   : > { %800 = vst [vmem:[%s1635_s22 + $0x78] sm:$0xff] %v400_v2  ;;  %v402_v6 = vadd.f32 %v401_v5, %v1631_v23  ;;  %v545_v7 = vpop.f32.mrf.mxu1 }
 0x143   : > { %872 = vst [vmem:[%s1635_s22 + $0x2b8] sm:$0xff] %v544_v4  ;;  %v546_v8 = vadd.f32 %v545_v7, %v1631_v23  ;;  %v405_v9 = vpop.f32.mrf.mxu0 }
 0x144   : > { %801 = vst [vmem:[%s1635_s22 + $0x80] sm:$0xff] %v402_v6  ;;  %v406_v10 = vadd.f32 %v405_v9, %v1628_v0  ;;  %v549_v11 = vpop.f32.mrf.mxu1 }
 0x145   : > { %873 = vst [vmem:[%s1635_s22 + $0x2c0] sm:$0xff] %v546_v8  ;;  %v550_v12 = vadd.f32 %v549_v11, %v1628_v0  ;;  %v407_v13 = vpop.f32.mrf.mxu0 }
 0x146   : > { %803 = vst [vmem:[%s1635_s22 + $0x90] sm:$0xff] %v406_v10  ;;  %v408_v15 = vadd.f32 %v407_v13, %v1631_v23  ;;  %v551_v16 = vpop.f32.mrf.mxu1 }
 0x147   : > { %875 = vst [vmem:[%s1635_s22 + $0x2d0] sm:$0xff] %v550_v12  ;;  %v552_v17 = vadd.f32 %v551_v16, %v1631_v23  ;;  %v411_v18 = vpop.f32.mrf.mxu0 }
 0x148   : > { %804 = vst [vmem:[%s1635_s22 + $0x98] sm:$0xff] %v408_v15  ;;  %v412_v20 = vadd.f32 %v411_v18, %v1628_v0  ;;  %v555_v22 = vpop.f32.mrf.mxu1 }
 0x149   : > { %876 = vst [vmem:[%s1635_s22 + $0x2d8] sm:$0xff] %v552_v17  ;;  %v556_v24 = vadd.f32 %v555_v22, %v1628_v0  ;;  %v413_v19 = vpop.f32.mrf.mxu0 }
 0x14a   : > { %806 = vst [vmem:[%s1635_s22 + $0xa8] sm:$0xff] %v412_v20  ;;  %v414_v26 = vadd.f32 %v413_v19, %v1631_v23  ;;  %v557_v27 = vpop.f32.mrf.mxu1 }
 0x14b   : > { %878 = vst [vmem:[%s1635_s22 + $0x2e8] sm:$0xff] %v556_v24  ;;  %v558_v28 = vadd.f32 %v557_v27, %v1631_v23  ;;  %v417_v29 = vpop.f32.mrf.mxu0 }
 0x14c   : > { %807 = vst [vmem:[%s1635_s22 + $0xb0] sm:$0xff] %v414_v26  ;;  %v418_v30 = vadd.f32 %v417_v29, %v1628_v0  ;;  %v1077_v31 = vpop.f32.mrf.mxu1 }
 0x14d   : > { %879 = vst [vmem:[%s1635_s22 + $0x2f0] sm:$0xff] %v558_v28  ;;  %v632_v21 = vadd.f32 %v1077_v31, %v1695_v25  ;;  %v419_v32 = vpop.f32.mrf.mxu0 }
 0x14e   : > { %809 = vst [vmem:[%s1635_s22 + $0xc0] sm:$0xff] %v418_v30  ;;  %v420_v33 = vadd.f32 %v419_v32, %v1631_v23  ;;  %v626_v34 = vpop.f32.mrf.mxu1 }
 0x14f   : > { %790 = vst [vmem:[%s1635_s22 + $0x28] sm:$0xff] %v632_v21  ;;  %v627_v35 = vadd.f32 %v626_v34, %v1695_v25  ;;  %v423_v36 = vpop.f32.mrf.mxu0 }
 0x150   : > { %810 = vst [vmem:[%s1635_s22 + $0xc8] sm:$0xff] %v420_v33  ;;  %v424_v37 = vadd.f32 %v423_v36, %v1628_v0  ;;  %v1080_v38 = vpop.f32.mrf.mxu1 }
 0x151   : > { %787 = vst [vmem:[%s1635_s22 + $0x10] sm:$0xff] %v627_v35  ;;  %v642_v39 = vadd.f32 %v1080_v38, %v1695_v25  ;;  %v425_v40 = vpop.f32.mrf.mxu0 }
 0x152   : > { %812 = vst [vmem:[%s1635_s22 + $0xd8] sm:$0xff] %v424_v37  ;;  %v426_v41 = vadd.f32 %v425_v40, %v1631_v23  ;;  %v636_v42 = vpop.f32.mrf.mxu1 }
 0x153   : > { %796 = vst [vmem:[%s1635_s22 + $0x58] sm:$0xff] %v642_v39  ;;  %v637_v43 = vadd.f32 %v636_v42, %v1695_v25  ;;  %v429_v44 = vpop.f32.mrf.mxu0 }
 0x154   : > { %813 = vst [vmem:[%s1635_s22 + $0xe0] sm:$0xff] %v426_v41  ;;  %v430_v45 = vadd.f32 %v429_v44, %v1628_v0  ;;  %v1083_v46 = vpop.f32.mrf.mxu1 }
 0x155   : > { %793 = vst [vmem:[%s1635_s22 + $0x40] sm:$0xff] %v637_v43  ;;  %v652_v47 = vadd.f32 %v1083_v46, %v1695_v25  ;;  %v431_v48 = vpop.f32.mrf.mxu0 }
 0x156   : > { %815 = vst [vmem:[%s1635_s22 + $0xf0] sm:$0xff] %v430_v45  ;;  %v432_v49 = vadd.f32 %v431_v48, %v1631_v23  ;;  %v646_v50 = vpop.f32.mrf.mxu1 }
 0x157   : > { %802 = vst [vmem:[%s1635_s22 + $0x88] sm:$0xff] %v652_v47  ;;  %v647_v51 = vadd.f32 %v646_v50, %v1695_v25  ;;  %v435_v52 = vpop.f32.mrf.mxu0 }
 0x158   : > { %816 = vst [vmem:[%s1635_s22 + $0xf8] sm:$0xff] %v432_v49  ;;  %v436_v53 = vadd.f32 %v435_v52, %v1628_v0  ;;  %v1086_v54 = vpop.f32.mrf.mxu1 }
 0x159   : > { %799 = vst [vmem:[%s1635_s22 + $0x70] sm:$0xff] %v647_v51  ;;  %v662_v55 = vadd.f32 %v1086_v54, %v1695_v25  ;;  %v437_v56 = vpop.f32.mrf.mxu0 }
 0x15a   : > { %818 = vst [vmem:[%s1635_s22 + $0x108] sm:$0xff] %v436_v53  ;;  %v438_v57 = vadd.f32 %v437_v56, %v1631_v23  ;;  %v656_v58 = vpop.f32.mrf.mxu1 }
 0x15b   : > { %808 = vst [vmem:[%s1635_s22 + $0xb8] sm:$0xff] %v662_v55  ;;  %v657_v59 = vadd.f32 %v656_v58, %v1695_v25  ;;  %v441_v60 = vpop.f32.mrf.mxu0 }
 0x15c   : > { %819 = vst [vmem:[%s1635_s22 + $0x110] sm:$0xff] %v438_v57  ;;  %v442_v61 = vadd.f32 %v441_v60, %v1628_v0  ;;  %v1089_v62 = vpop.f32.mrf.mxu1 }
 0x15d   : > { %805 = vst [vmem:[%s1635_s22 + $0xa0] sm:$0xff] %v657_v59  ;;  %v672_v63 = vadd.f32 %v1089_v62, %v1695_v25  ;;  %v443_v1 = vpop.f32.mrf.mxu0 }
 0x15e   : > { %821 = vst [vmem:[%s1635_s22 + $0x120] sm:$0xff] %v442_v61  ;;  %v444_v2 = vadd.f32 %v443_v1, %v1631_v23  ;;  %v666_v3 = vpop.f32.mrf.mxu1 }
 0x15f   : > { %814 = vst [vmem:[%s1635_s22 + $0xe8] sm:$0xff] %v672_v63  ;;  %v667_v4 = vadd.f32 %v666_v3, %v1695_v25  ;;  %v447_v5 = vpop.f32.mrf.mxu0 }
 0x160   : > { %822 = vst [vmem:[%s1635_s22 + $0x128] sm:$0xff] %v444_v2  ;;  %v448_v6 = vadd.f32 %v447_v5, %v1628_v0  ;;  %v1092_v7 = vpop.f32.mrf.mxu1 }
 0x161   : > { %811 = vst [vmem:[%s1635_s22 + $0xd0] sm:$0xff] %v667_v4  ;;  %v682_v8 = vadd.f32 %v1092_v7, %v1695_v25  ;;  %v449_v9 = vpop.f32.mrf.mxu0 }
 0x162   : > { %824 = vst [vmem:[%s1635_s22 + $0x138] sm:$0xff] %v448_v6  ;;  %v450_v10 = vadd.f32 %v449_v9, %v1631_v23  ;;  %v676_v11 = vpop.f32.mrf.mxu1 }
 0x163   : > { %820 = vst [vmem:[%s1635_s22 + $0x118] sm:$0xff] %v682_v8  ;;  %v677_v12 = vadd.f32 %v676_v11, %v1695_v25  ;;  %v453_v13 = vpop.f32.mrf.mxu0 }
 0x164   : > { %825 = vst [vmem:[%s1635_s22 + $0x140] sm:$0xff] %v450_v10  ;;  %v454_v14 = vadd.f32 %v453_v13, %v1628_v0  ;;  %v1095_v15 = vpop.f32.mrf.mxu1 }
 0x165   : > { %817 = vst [vmem:[%s1635_s22 + $0x100] sm:$0xff] %v677_v12  ;;  %v692_v16 = vadd.f32 %v1095_v15, %v1695_v25  ;;  %v455_v17 = vpop.f32.mrf.mxu0 }
 0x166   : > { %827 = vst [vmem:[%s1635_s22 + $0x150] sm:$0xff] %v454_v14  ;;  %v456_v18 = vadd.f32 %v455_v17, %v1631_v23  ;;  %v686_v20 = vpop.f32.mrf.mxu1 }
 0x167   : > { %826 = vst [vmem:[%s1635_s22 + $0x148] sm:$0xff] %v692_v16  ;;  %v687_v22 = vadd.f32 %v686_v20, %v1695_v25  ;;  %v459_v24 = vpop.f32.mrf.mxu0 }
 0x168   : > { %828 = vst [vmem:[%s1635_s22 + $0x158] sm:$0xff] %v456_v18  ;;  %v460_v19 = vadd.f32 %v459_v24, %v1628_v0  ;;  %v1098_v26 = vpop.f32.mrf.mxu1 }
 0x169   : > { %823 = vst [vmem:[%s1635_s22 + $0x130] sm:$0xff] %v687_v22  ;;  %v702_v27 = vadd.f32 %v1098_v26, %v1695_v25  ;;  %v461_v28 = vpop.f32.mrf.mxu0 }
 0x16a   : > { %830 = vst [vmem:[%s1635_s22 + $0x168] sm:$0xff] %v460_v19  ;;  %v462_v29 = vadd.f32 %v461_v28, %v1631_v23  ;;  %v696_v30 = vpop.f32.mrf.mxu1 }
 0x16b   : > { %832 = vst [vmem:[%s1635_s22 + $0x178] sm:$0xff] %v702_v27  ;;  %v697_v31 = vadd.f32 %v696_v30, %v1695_v25  ;;  %v465_v21 = vpop.f32.mrf.mxu0 }
 0x16c   : > { %831 = vst [vmem:[%s1635_s22 + $0x170] sm:$0xff] %v462_v29  ;;  %v466_v32 = vadd.f32 %v465_v21, %v1628_v0  ;;  %v1101_v33 = vpop.f32.mrf.mxu1 }
 0x16d   : > { %829 = vst [vmem:[%s1635_s22 + $0x160] sm:$0xff] %v697_v31  ;;  %v712_v34 = vadd.f32 %v1101_v33, %v1695_v25  ;;  %v467_v35 = vpop.f32.mrf.mxu0 }
 0x16e   : > { %833 = vst [vmem:[%s1635_s22 + $0x180] sm:$0xff] %v466_v32  ;;  %v468_v36 = vadd.f32 %v467_v35, %v1631_v23  ;;  %v706_v37 = vpop.f32.mrf.mxu1 }
 0x16f   : > { %838 = vst [vmem:[%s1635_s22 + $0x1a8] sm:$0xff] %v712_v34  ;;  %v707_v38 = vadd.f32 %v706_v37, %v1695_v25  ;;  %v471_v39 = vpop.f32.mrf.mxu0 }
 0x170   : > { %834 = vst [vmem:[%s1635_s22 + $0x188] sm:$0xff] %v468_v36  ;;  %v472_v40 = vadd.f32 %v471_v39, %v1628_v0  ;;  %v1104_v41 = vpop.f32.mrf.mxu1 }
 0x171   : > { %835 = vst [vmem:[%s1635_s22 + $0x190] sm:$0xff] %v707_v38  ;;  %v722_v42 = vadd.f32 %v1104_v41, %v1695_v25  ;;  %v473_v43 = vpop.f32.mrf.mxu0 }
 0x172   : > { %836 = vst [vmem:[%s1635_s22 + $0x198] sm:$0xff] %v472_v40  ;;  %v474_v44 = vadd.f32 %v473_v43, %v1631_v23  ;;  %v716_v45 = vpop.f32.mrf.mxu1 }
 0x173   : > { %844 = vst [vmem:[%s1635_s22 + $0x1d8] sm:$0xff] %v722_v42  ;;  %v717_v46 = vadd.f32 %v716_v45, %v1695_v25  ;;  %v477_v47 = vpop.f32.mrf.mxu0 }
 0x174   : > { %837 = vst [vmem:[%s1635_s22 + $0x1a0] sm:$0xff] %v474_v44  ;;  %v478_v48 = vadd.f32 %v477_v47, %v1628_v0  ;;  %v1107_v49 = vpop.f32.mrf.mxu1 }
 0x175   : > { %841 = vst [vmem:[%s1635_s22 + $0x1c0] sm:$0xff] %v717_v46  ;;  %v732_v50 = vadd.f32 %v1107_v49, %v1695_v25  ;;  %v479_v51 = vpop.f32.mrf.mxu0 }
 0x176   : > { %839 = vst [vmem:[%s1635_s22 + $0x1b0] sm:$0xff] %v478_v48  ;;  %v480_v52 = vadd.f32 %v479_v51, %v1631_v23  ;;  %v726_v53 = vpop.f32.mrf.mxu1 }
 0x177   : > { %850 = vst [vmem:[%s1635_s22 + $0x208] sm:$0xff] %v732_v50  ;;  %v727_v54 = vadd.f32 %v726_v53, %v1695_v25  ;;  %v483_v55 = vpop.f32.mrf.mxu0 }
 0x178   : > { %840 = vst [vmem:[%s1635_s22 + $0x1b8] sm:$0xff] %v480_v52  ;;  %v484_v56 = vadd.f32 %v483_v55, %v1628_v0  ;;  %v1110_v57 = vpop.f32.mrf.mxu1 }
 0x179   : > { %847 = vst [vmem:[%s1635_s22 + $0x1f0] sm:$0xff] %v727_v54  ;;  %v742_v58 = vadd.f32 %v1110_v57, %v1695_v25  ;;  %v485_v59 = vpop.f32.mrf.mxu0 }
 0x17a   : > { %842 = vst [vmem:[%s1635_s22 + $0x1c8] sm:$0xff] %v484_v56  ;;  %v486_v60 = vadd.f32 %v485_v59, %v1631_v23  ;;  %v736_v61 = vpop.f32.mrf.mxu1 }
 0x17b   : > { %856 = vst [vmem:[%s1635_s22 + $0x238] sm:$0xff] %v742_v58  ;;  %v737_v62 = vadd.f32 %v736_v61, %v1695_v25  ;;  %v489_v63 = vpop.f32.mrf.mxu0 }
 0x17c   : > { %843 = vst [vmem:[%s1635_s22 + $0x1d0] sm:$0xff] %v486_v60  ;;  %v490_v1 = vadd.f32 %v489_v63, %v1628_v0  ;;  %v1113_v2 = vpop.f32.mrf.mxu1 }
 0x17d   : > { %853 = vst [vmem:[%s1635_s22 + $0x220] sm:$0xff] %v737_v62  ;;  %v752_v3 = vadd.f32 %v1113_v2, %v1695_v25  ;;  %v491_v4 = vpop.f32.mrf.mxu0 }
 0x17e   : > { %845 = vst [vmem:[%s1635_s22 + $0x1e0] sm:$0xff] %v490_v1  ;;  %v492_v5 = vadd.f32 %v491_v4, %v1631_v23  ;;  %v746_v6 = vpop.f32.mrf.mxu1 }
 0x17f   : > { %862 = vst [vmem:[%s1635_s22 + $0x268] sm:$0xff] %v752_v3  ;;  %v747_v7 = vadd.f32 %v746_v6, %v1695_v25  ;;  %v495_v8 = vpop.f32.mrf.mxu0 }
 0x180   : > { %846 = vst [vmem:[%s1635_s22 + $0x1e8] sm:$0xff] %v492_v5  ;;  %v496_v9 = vadd.f32 %v495_v8, %v1628_v0  ;;  %v1116_v10 = vpop.f32.mrf.mxu1 }
 0x181   : > { %859 = vst [vmem:[%s1635_s22 + $0x250] sm:$0xff] %v747_v7  ;;  %v762_v11 = vadd.f32 %v1116_v10, %v1695_v25  ;;  %v497_v12 = vpop.f32.mrf.mxu0 }
 0x182   : > { %848 = vst [vmem:[%s1635_s22 + $0x1f8] sm:$0xff] %v496_v9  ;;  %v498_v13 = vadd.f32 %v497_v12, %v1631_v23  ;;  %v756_v14 = vpop.f32.mrf.mxu1 }
 0x183   : > { %868 = vst [vmem:[%s1635_s22 + $0x298] sm:$0xff] %v762_v11  ;;  %v757_v15 = vadd.f32 %v756_v14, %v1695_v25  ;;  %v501_v16 = vpop.f32.mrf.mxu0 }
 0x184   : > { %849 = vst [vmem:[%s1635_s22 + $0x200] sm:$0xff] %v498_v13  ;;  %v502_v17 = vadd.f32 %v501_v16, %v1628_v0  ;;  %v1119_v18 = vpop.f32.mrf.mxu1 }
 0x185   : > { %865 = vst [vmem:[%s1635_s22 + $0x280] sm:$0xff] %v757_v15  ;;  %v772_v20 = vadd.f32 %v1119_v18, %v1695_v25  ;;  %v503_v22 = vpop.f32.mrf.mxu0 }
 0x186   : > { %851 = vst [vmem:[%s1635_s22 + $0x210] sm:$0xff] %v502_v17  ;;  %v504_v24 = vadd.f32 %v503_v22, %v1631_v23  ;;  %v766_v19 = vpop.f32.mrf.mxu1 }
 0x187   : > { %874 = vst [vmem:[%s1635_s22 + $0x2c8] sm:$0xff] %v772_v20  ;;  %v767_v26 = vadd.f32 %v766_v19, %v1695_v25  ;;  %v507_v27 = vpop.f32.mrf.mxu0 }
 0x188   : > { %852 = vst [vmem:[%s1635_s22 + $0x218] sm:$0xff] %v504_v24  ;;  %v508_v28 = vadd.f32 %v507_v27, %v1628_v0  ;;  %v1122_v29 = vpop.f32.mrf.mxu1 }
 0x189   : > { %871 = vst [vmem:[%s1635_s22 + $0x2b0] sm:$0xff] %v767_v26  ;;  %v782_v30 = vadd.f32 %v1122_v29, %v1695_v25  ;;  %v509_v31 = vpop.f32.mrf.mxu0 }
 0x18a   : > { %854 = vst [vmem:[%s1635_s22 + $0x228] sm:$0xff] %v508_v28  ;;  %v510_v21 = vadd.f32 %v509_v31, %v1631_v23  ;;  %v776_v32 = vpop.f32.mrf.mxu1 }
 0x18b   : > { %880 = vst [vmem:[%s1635_s22 + $0x2f8] sm:$0xff] %v782_v30  ;;  %v777_v0 = vadd.f32 %v776_v32, %v1695_v25 }
 0x18c   : > { %855 = vst [vmem:[%s1635_s22 + $0x230] sm:$0xff] %v510_v21 }
 0x18d   : > { %877 = vst [vmem:[%s1635_s22 + $0x2e0] sm:$0xff] %v777_v0 }
 0x18e   : > { %1288 = shalt.err (!%p1285_p0)
}
 0x18f   : > { %s1289_s21 = scalar_lea.hbm %s1832_s4, 12288  ;;  %s1293_s29 = scalar_lea.hbm %s1884_s3, 24576 }
 0x190   : > { %p1290_p5 = scmp.ne.s32.totalorder %s1832_s4, %s1289_s21  ;;  %p1294_p4 = scmp.lt.s32.totalorder %s1832_s4, %s1884_s3 }
 0x191   : > { %p1295_p6 = scmp.lt.s32.totalorder %s1293_s29, %s1289_s21 }
 0x192   : > { %p1291_p9 = pnand %p1290_p5, %p1900_p11 }
 0x193   : > { %p1296_p8 = por %p1295_p6, %p1294_p4 }
 0x194   : > { %p1292_p1 = pneg %p1291_p9 }
 0x196   : > { %p1297_p3 = pnand %p1296_p8, %p1292_p1 }
 0x198   : > { %1300 = shalt.err (!%p1297_p3)
}
 0x199   : > { %s1353_s17 = smov 384   ;;  %s1354_s22 = smov 24  }
 0x19a   : > { %1163 = dma.vmem_to_hbm [thread:$0]  (%p1900_p11), %s1834_s25, 12288, %s1832_s4, %s882_s7, %s1353_s17, %s1353_s17, %s1354_s22  }
 0x19b PF: > { %s911_s23 = sand.u32 1, %s1331_s12   ;;  %p1901_p7 = scmp.ne.s32.totalorder %s1890_s19, 0 }
 0x19c   : > { %p1902_p12 = scmp.ge.s32.totalorder %s1343_s15, 2  ;;  %s912_s16 = scalar_lea.sflag [#allocation4], %s911_s23 }
 0x19e   : > { %p1174_p10 = pnand %p1902_p12, %p1901_p7 }
 0x1a0   : > { %p1175_p2 = pneg %p1174_p10 }
 0x1a2   : > { %1326 = dma.done.wait (%p1175_p2), %s912_s16, 12288  }
 0x1a3   : > { %1328 = vsyncadd (%p1175_p2), %s912_s16, 4294955008  ;;  %p17_p13 = scmp.ge.s32.totalorder %s1429_s24, 4   ;;  %s1903_s12 = smov %s1335_s13 }
 0x1a4   : > { %s1904_s13 = smov %s1339_s14  ;;  %s1905_s14 = smov %s1446_s5 }
 0x1a5   : > { %s1906_s15 = smov %s1429_s24  ;;  %19 = sbr.rel (!%p17_p13) target bundleno = 6 (0x6), region = 81 }
 0x1aa   :  { %917 = vsyncpa [#allocation3], 1 }
 0x1ab   :  { %919 = vsyncpa [#allocation3 + $0x1], 1 }
 0x1ac   :  { %920 = vsyncpa [#allocation6], 1 }
 0x1ad   :  { %921 = vsyncpa [#allocation4], 1 }
 0x1ae   :  { %923 = vsyncpa [#allocation4 + $0x1], 1 }

</bundles_post_ra>
